<compile_context>
chip_gen: v7x
topology: tpu7x:2x2x1
jax: 0.10.0
libtpu: 0.0.40
codegen_flags: <defaults>
</compile_context>

<pallas_src>
import math
import numpy as np
import jax
import jax.numpy as jnp
from jax.experimental import pallas as pl
from jax.experimental.pallas import tpu as pltpu


# ------------------------------ Pallas kernel -------------------------------


def _hope_kernel(chan_ref, o_ref):
    """One (tq, S, D) slab of the (S, S, D) HoPE tensor."""
    tq, S, D = o_ref.shape
    i = pl.program_id(0)

    chan = chan_ref[...]                       # (4, D) packed per-channel consts
    freq = chan[0][None, None, :]              # (1, 1, D)
    phase = chan[1][None, None, :]
    himask = chan[2][None, None, :]
    pivec = chan[3][None, None, :]

    # rel[a, b, :] = (i*tq + a) - b, built directly in the (tq, S, D) layout
    # (no 2-D -> 3-D broadcast across lanes).
    qi = jax.lax.broadcasted_iota(jnp.int32, (tq, S, D), 0)
    kj = jax.lax.broadcasted_iota(jnp.int32, (tq, S, D), 1)
    rel = (qi - kj + i * tq).astype(jnp.float32)

    theta = rel * freq - phase
    # sin(x) == cos(x - pi/2): one transcendental per element; inactive
    # channels get cos(0)*0 + pi_vec = the learned position-independent value.
    out = jnp.cos(theta) * himask + pivec
    o_ref[...] = out.astype(o_ref.dtype)


# ------------------------------ host wrapper --------------------------------


def _static_active_components(seq_len, d_model, base):
    """Mirror of HoPE._calculate_active_components (static host-side math)."""
    dim = d_model // 2
    max_pi = d_model // 4
    pos = np.arange(dim, dtype=np.float32)
    freqs = (1.0 / np.power(np.float32(base), pos / np.float32(dim))).astype(np.float32)
    active = int(np.sum(freqs * np.float32(2.0 * math.pi) * np.float32(seq_len) >= 1.0))
    return min(active, dim - max_pi), freqs


def _pick_tq(S, D, dtype_bytes, slab_budget_bytes):
    """Rows per output slab: largest tq with tq*S*D*dtype <= budget, preferring
    a divisor of S with an even grid of >= 4 steps (keeps both v7x TCs busy)."""
    bytes_per_row = S * D * dtype_bytes
    tq_cap = max(1, min(S, slab_budget_bytes // bytes_per_row))
    # Pass 1: divisor of S, >= 4 grid steps, even step count.
    for tq in range(tq_cap, 0, -1):
        if S % tq == 0 and (S // tq) >= 4 and (S // tq) % 2 == 0:
            return tq
    # Pass 2: divisor of S, >= 2 grid steps.
    for tq in range(tq_cap, 0, -1):
        if S % tq == 0 and (S // tq) >= 2:
            return tq
    # Pass 3: no nice divisor (e.g. prime S) -- non-divisible grid; Pallas
    # masks the partial final slab.  Second/last block dims stay full-extent
    # so the (8,128) rule is still satisfied.
    return tq_cap


def hope_forward(position_independent, seq_len, d_model, base=10000,
                 out_dtype=jnp.float32, slab_budget_bytes=8 * 1024 * 1024):
    dim = d_model // 2
    active, freqs = _static_active_components(seq_len, d_model, base)
    latter = dim - active

    # Per-channel constant vectors matching torch's interleaved reshape layout.
    freq_ch = np.zeros((d_model,), np.float32)
    phase_ch = np.zeros((d_model,), np.float32)
    himask = np.zeros((d_model,), np.float32)
    freq_ch[0:2 * active:2] = freqs[:active]
    freq_ch[1:2 * active:2] = freqs[:active]
    phase_ch[1:2 * active:2] = np.float32(math.pi / 2.0)   # sin via phase shift
    himask[:2 * active] = 1.0

    pi_flat = jnp.asarray(position_independent, jnp.float32)[:latter].reshape(-1)
    if pi_flat.shape[0] != d_model - 2 * active:
        # Same constraint torch's final .reshape(seq_len, seq_len, d_model)
        # imposes when latter > max_position_independent (small seq_len).
        raise ValueError("position_independent too small for the inactive band")
    pi_vec = jnp.concatenate([jnp.zeros((2 * active,), jnp.float32), pi_flat])

    chan = jnp.concatenate(
        [jnp.asarray(np.stack([freq_ch, phase_ch, himask], axis=0)),
         pi_vec[None, :]],
        axis=0,
    )                                                       # (4, D) f32

    dtype_bytes = jnp.dtype(out_dtype).itemsize
    tq = _pick_tq(seq_len, d_model, dtype_bytes, slab_budget_bytes)
    grid = (pl.cdiv(seq_len, tq),)

    cost = pl.CostEstimate(
        flops=4 * seq_len * seq_len * d_model,
        transcendentals=seq_len * seq_len * d_model,
        bytes_accessed=seq_len * seq_len * d_model * dtype_bytes + 4 * d_model * 4,
    )

    return pl.pallas_call(
        _hope_kernel,
        out_shape=jax.ShapeDtypeStruct((seq_len, seq_len, d_model), out_dtype),
        grid=grid,
        in_specs=[pl.BlockSpec((4, d_model), lambda i: (0, 0))],
        out_specs=pl.BlockSpec((tq, seq_len, d_model), lambda i: (i, 0, 0)),
        compiler_params=pltpu.CompilerParams(
            dimension_semantics=("parallel",),
            vmem_limit_bytes=48 * 1024 * 1024,
        ),
        cost_estimate=cost,
    )(chan)


# --------------------------- pure-JAX reference ------------------------------


def hope_reference(position_independent, seq_len, d_model, base=10000):
    """Direct transcription of HoPE.forward (stack / cat / reshape)."""
    dim = d_model // 2
    active, freqs = _static_active_components(seq_len, d_model, base)
    positions = jnp.arange(seq_len, dtype=jnp.float32)
    rel = positions[:, None] - positions[None, :]                    # (S, S)
    theta = rel[:, :, None] * jnp.asarray(freqs[:active])[None, None, :]
    high = jnp.stack([jnp.cos(theta), jnp.sin(theta)], axis=-1)      # (S,S,a,2)
    latter = dim - active
    pos_ind = jnp.broadcast_to(
        jnp.asarray(position_independent, jnp.float32)[:latter][None, None],
        (seq_len, seq_len, latter, 2),
    )
    combined = jnp.concatenate([high, pos_ind], axis=2)              # (S,S,dim,2)
    return combined.reshape(seq_len, seq_len, d_model)


# ---------------------------------- main -------------------------------------


if __name__ == "__main__":
    seq_len, d_model, base = 16, 128, 10000
    key = jax.random.PRNGKey(0)
    position_independent = jax.random.normal(
        key, (d_model // 4, 2), dtype=jnp.float32)

    out = hope_forward(position_independent, seq_len, d_model, base)
    out = jax.block_until_ready(out)

    ref = hope_reference(position_independent, seq_len, d_model, base)
    assert out.shape == (seq_len, seq_len, d_model)
    assert np.all(np.isfinite(np.asarray(out)))
    assert np.allclose(np.asarray(out), np.asarray(ref), rtol=1e-4, atol=1e-4)
    print("KERNEL_OK")
</pallas_src>

<mosaic_0001>
module attributes {stable_mosaic.version = 11 : i64} {
  func.func @_hope_kernel(%arg0: i32, %arg1: memref<4x128xf32, #tpu.memory_space<vmem>>, %arg2: memref<4x16x128xf32, #tpu.memory_space<vmem>>) attributes {dimension_semantics = [#tpu.dimension_semantics<parallel>], iteration_bounds = array<i64: 4>, scalar_prefetch = 0 : i64, scratch_operands = 0 : i64, tpu.core_type = #tpu.core_type<tc>, window_params = [{pipeline_mode = #tpu.pipeline_mode<synchronous>, transform_indices = @transform_0, window_bounds = array<i64: 4, 128>}, {transform_indices = @transform_1, window_bounds = array<i64: 4, 16, 128>}]} {
    %c0 = arith.constant 0 : index
    %c0_0 = arith.constant 0 : index
    %0 = vector.load %arg1[%c0, %c0_0] : memref<4x128xf32, #tpu.memory_space<vmem>>, vector<4x128xf32>
    %1 = vector.extract_strided_slice %0 {offsets = [0, 0], sizes = [1, 128], strides = [1, 1]} : vector<4x128xf32> to vector<1x128xf32>
    %2 = vector.shape_cast %1 : vector<1x128xf32> to vector<128xf32>
    %3 = vector.shape_cast %2 : vector<128xf32> to vector<1x1x128xf32>
    %4 = vector.extract_strided_slice %0 {offsets = [1, 0], sizes = [1, 128], strides = [1, 1]} : vector<4x128xf32> to vector<1x128xf32>
    %5 = vector.shape_cast %4 : vector<1x128xf32> to vector<128xf32>
    %6 = vector.shape_cast %5 : vector<128xf32> to vector<1x1x128xf32>
    %7 = vector.extract_strided_slice %0 {offsets = [2, 0], sizes = [1, 128], strides = [1, 1]} : vector<4x128xf32> to vector<1x128xf32>
    %8 = vector.shape_cast %7 : vector<1x128xf32> to vector<128xf32>
    %9 = vector.shape_cast %8 : vector<128xf32> to vector<1x1x128xf32>
    %10 = vector.extract_strided_slice %0 {offsets = [3, 0], sizes = [1, 128], strides = [1, 1]} : vector<4x128xf32> to vector<1x128xf32>
    %11 = vector.shape_cast %10 : vector<1x128xf32> to vector<128xf32>
    %12 = vector.shape_cast %11 : vector<128xf32> to vector<1x1x128xf32>
    %13 = tpu.iota {dimensions = array<i32: 0>} : vector<4x16x128xi32>
    %14 = tpu.iota {dimensions = array<i32: 1>} : vector<4x16x128xi32>
    %15 = arith.subi %13, %14 : vector<4x16x128xi32>
    %c4_i32 = arith.constant 4 : i32
    %16 = arith.muli %arg0, %c4_i32 : i32
    %17 = vector.broadcast %16 : i32 to vector<4x16x128xi32>
    %18 = arith.addi %15, %17 : vector<4x16x128xi32>
    %19 = arith.sitofp %18 : vector<4x16x128xi32> to vector<4x16x128xf32>
    %20 = vector.broadcast %3 : vector<1x1x128xf32> to vector<4x16x128xf32>
    %21 = arith.mulf %19, %20 : vector<4x16x128xf32>
    %22 = vector.broadcast %6 : vector<1x1x128xf32> to vector<4x16x128xf32>
    %23 = arith.subf %21, %22 : vector<4x16x128xf32>
    %24 = math.cos %23 : vector<4x16x128xf32>
    %25 = vector.broadcast %9 : vector<1x1x128xf32> to vector<4x16x128xf32>
    %26 = arith.mulf %24, %25 : vector<4x16x128xf32>
    %27 = vector.broadcast %12 : vector<1x1x128xf32> to vector<4x16x128xf32>
    %28 = arith.addf %26, %27 : vector<4x16x128xf32>
    %c0_1 = arith.constant 0 : index
    %c0_2 = arith.constant 0 : index
    %c0_3 = arith.constant 0 : index
    %29 = vector.load %arg2[%c0_1, %c0_2, %c0_3] : memref<4x16x128xf32, #tpu.memory_space<vmem>>, vector<4x16x128xf32>
    tpu.vector_store %arg2[%c0_1, %c0_2, %c0_3], %28 {strides = array<i32>} : memref<4x16x128xf32, #tpu.memory_space<vmem>>, vector<4x16x128xf32>,
    return
  }
  func.func @transform_0(%arg0: i32) -> (i32, i32) {
    %c0_i32 = arith.constant 0 : i32
    %c0_i32_0 = arith.constant 0 : i32
    %c0_i32_1 = arith.constant 0 : i32
    return %c0_i32, %c0_i32_0 : i32, i32
  }
  func.func @transform_1(%arg0: i32) -> (i32, i32, i32) {
    %c0_i32 = arith.constant 0 : i32
    %c0_i32_0 = arith.constant 0 : i32
    %c0_i32_1 = arith.constant 0 : i32
    return %arg0, %c0_i32, %c0_i32_0 : i32, i32, i32
  }
}

</mosaic_0001>

<bundles_post_ra>
// kernel: tpu_custom_call.1
= control target key start
LH: loop header
LB: loop body
LE: loop exit
PB: predicated region body
PF: predicated region fallthrough
CT: control target
= control target key end

     0   :  { %6 = vsyncpa [#allocation3], 0  ;;  %s2327_s0 = inlined_call_operand.hbm [shape: f32[4,128], index: 0, kind: input, shape index: {}]   ;;  %s2328_s1 = inlined_call_operand.hbm [shape: f32[16,16,128], index: 1, kind: output, shape index: {}]  }
   0x1   :  { %7 = vsyncpa [#allocation4], 0 }
   0x2   :  { %9 = vsyncpa [#allocation4 + $0x1], 0  ;;  %s1382_s6 = smov 0   ;;  %s1384_s7 = smov 0  }
   0x3   :  { %s1386_s8 = smov 0   ;;  %s1388_s9 = smov 0  }
   0x4 LB: > { %s1403_s10 = sadd.s32 4294967295, %s1360_s9   ;;  %s1096_s11 = sadd.s32 4294967294, %s1360_s9   ;;  %s1360_s9 = sphi %s1388_s9, %s2356_s9   ;;  %s1356_s8 = sphi %s1386_s8, %s2355_s8   ;;  %s1352_s7 = sphi %s1384_s7, %s2354_s7   ;;  %s1348_s6 = sphi %s1382_s6, %s2353_s6  }
   0x5   : > { %s1407_s12 = sadd.s32 1, %s1360_s9   ;;  %s43_s13 = sadd.s32 1, %s1356_s8 }
   0x6   : > { %s40_s14 = ssub.s32 %s1360_s9, %s1407_s12  ;;  %p53_p0 = scmp.ne.s32.totalorder %s1356_s8, %s1352_s7 }
   0x7   : > { %p41_p1 = scmp.eq.s32.totalorder %s40_s14, 0  ;;  %p54_p2 = scmp.eq.s32.totalorder %s1403_s10, 3 }
   0x8   : > { %p59_p3 = scmp.ne.s32.totalorder %s1352_s7, %s1348_s6  ;;  %p60_p4 = scmp.eq.s32.totalorder %s1096_s11, 3 }
   0x9   : > { %s1418_s15 = scalar_select %p41_p1, %s1356_s8, %s43_s13  }
   0xa   : > { %p1420_p5 = por %p54_p2, %p53_p0  ;;  %p1424_p6 = por %p60_p4, %p59_p3 }
   0xb   : > { %p1097_p7 = scmp.ge.s32.totalorder %s1360_s9, 1  ;;  %p67_p8 = scmp.lt.s32.totalorder %s1360_s9, 5 }
   0xc   : > { %s2332_s16 = scalar_select %p1420_p5, 1, 0 }
   0xd   : > { %s2333_s17 = scalar_select %p1424_p6, 1, 0 }
   0xe   : > { %p2329_p9 = scmp.eq.s32.totalorder %s1403_s10, 0  ;;  %p1431_p10 = pnand %p1097_p7, %p67_p8 }
   0xf   : > { %s1362_s19 = smov [#allocation2]   ;;  %s1266_s24 = scalar_lea.hbm %s2327_s0, 64 }
  0x10   : > { %s2334_s18 = scalar_select %p1431_p10, 1, 0 }
  0x11   : > { %s80_s20 = sshll.u32 %s1362_s19, 4  ;;  %p1181_p11 = pneg %p1431_p10  ;;  %s81_s20 = int_to_ptr.vmem [resolvable:$true] %s80_s20 }
  0x12   : > { %p1267_p13 = scmp.ne.s32.totalorder %s2327_s0, %s1266_s24  ;;  %p1273_p3 = scmp.lt.u32.totalorder %s1266_s24, %s2327_s0 }
  0x13   : > { %p1439_p12 = pnand %p2329_p9, %p1181_p11 }
  0x15   : > { %p1268_p0 = pneg %p1439_p12 }
  0x17   : > { %p1269_p1 = pnand %p1268_p0, %p1267_p13 }
  0x19   : > { %p1270_p2 = pneg %p1269_p1 }
  0x1b   : > { %p1275_p4 = pnand %p1273_p3, %p1270_p2 }
  0x1d   : > { %1278 = shalt.err (!%p1275_p4)
}
  0x1e   : > { %s1279_s29 = scalar_lea.vmem %s81_s20, 64  ;;  %p1287_p9 = scmp.lt.s32.totalorder %s81_s20, %s81_s20 }
  0x1f   : > { %p1280_p7 = scmp.ne.s32.totalorder %s81_s20, %s1279_s29  ;;  %p1288_p6 = scmp.lt.s32.totalorder %s1279_s29, %s1279_s29 }
  0x21   : > { %p1282_p8 = pnand %p1280_p7, %p1268_p0  ;;  %p1289_p5 = por %p1288_p6, %p1287_p9 }
  0x23   : > { %p1283_p11 = pneg %p1282_p8 }
  0x25   : > { %p1290_p10 = pnand %p1289_p5, %p1283_p11 }
  0x27   : > { %1293 = shalt.err (!%p1290_p10)
}
  0x28   : > { %1184 = dma.hbm_to_vmem [thread:$0]  (!%p1439_p12), %s2327_s0, 64, %s81_s20, [#allocation3]  }
  0x29   : > { %p2336_p13 = scmp.ne.s32.totalorder %s2334_s18, 0 }
  0x2a   : > { %p2337_p1 = scmp.eq.s32.totalorder (!%p2336_p13), %s1403_s10, 0 }
  0x2b   : > { %93 = sbr.rel (%p2336_p13) target bundleno = 324 (0x144), region = 24 }
  0x32   : > { %1339 = dma.done.wait (%p2337_p1), [#allocation3], 64   ;;  %p2338_p0 = pmov %p2337_p1 }
  0x33   : > { %v110_v0 = vlaneseq  ;;  %s1102_s3 = sshll.u32 %s1403_s10, 2  ;;  %v109_v10 = vld [vmem:[#allocation2] sm:$0xf]  ;;  %v1363_v59 = vmov 683565275   ;;  %s105_s4 = sand.u32 1, %s1352_s7  }
  0x34   : > { %1341 = vsyncadd (%p2338_p0), [#allocation3], 4294967232  ;;  %v1473_v5 = vstv %s1102_s3  ;;  %v1364_v61 = vmov 2475754826   ;;  %v1365_v63 = vmov 2131351028  }
  0x35   : > { %v1466_v1 = vshrl.u32 %v110_v0, 7  ;;  %s1101_s5 = sshll.u32 %s105_s4, 6  ;;  %s1142_s13 = sshll.u32 %s1403_s10, 10 }
  0x36   : > { %s2233_s11 = scalar_lea.vmem [#allocation5], %s1101_s5  ;;  %s2278_s20 = scalar_lea.hbm %s2328_s1, %s1142_s13 }
  0x37   : > { %v1469_v2 = vadd.s32 8, %v1466_v1  ;;  %v113_v3 = vsub.s32 0, %v1466_v1  ;;  %v115_v4 = vsub.s32 1, %v1466_v1  ;;  %v117_v47 = vsub.s32 2, %v1466_v1  ;;  %s1034_s14 = sshll.u32 %s2233_s11, 4  ;;  %s2286_s21 = scalar_lea.sflag [#allocation4], %s105_s4  ;;  %s2280_s14 = int_to_ptr.vmem [resolvable:$true] %s1034_s14 }
  0x38   : > { %s1294_s10 = scalar_lea.vmem %s2280_s14, 1024  ;;  %p2351_p6 = scmp.ne.s32.totalorder %s2332_s16, 0 }
  0x39   : > { %v114_v6 = vsub.s32 0, %v1469_v2  ;;  %v120_v7 = vsub.s32 3, %v1469_v2  ;;  %v123_v8 = vadd.s32 %v1473_v5, %v113_v3  ;;  %v125_v9 = vadd.s32 %v1473_v5, %v115_v4  ;;  %p1295_p5 = scmp.ne.s32.totalorder %s2280_s14, %s1294_s10  ;;  %s1369_s22 = smov [#allocation5]  }
  0x3a   : > { %v1481_v17 = vrot.slane %v109_v10, %v113_v3  ;;  %v1483_v18 = vrot.slane %v109_v10, %v115_v4  ;;  %v116_v22 = vsub.s32 1, %v1469_v2  ;;  %v1366_v3 = vmov 2102212464   ;;  %s1298_s23 = sshll.u32 %s1369_s22, 4  ;;  %s1299_s23 = int_to_ptr.vmem [resolvable:$false] %s1298_s23 }
  0x3b   : > { %v124_v11 = vadd.s32 %v1473_v5, %v114_v6  ;;  %v130_v12 = vadd.s32 %v1473_v5, %v120_v7  ;;  %v131_v13 = vcvt.s32.f32 %v123_v8  ;;  %v133_v14 = vcvt.s32.f32 %v125_v9  ;;  %p1296_p9 = pnand %p1295_p5, %p2351_p6  ;;  %s1300_s24 = scalar_lea.vmem %s1299_s23, 2048 }
  0x3c   : > { %v126_v30 = vadd.s32 %v1473_v5, %v116_v22  ;;  %v1367_v6 = vmov 920167782   ;;  %p1301_p12 = scmp.lt.s32.totalorder %s2280_s14, %s1299_s23  ;;  %p1302_p2 = scmp.lt.s32.totalorder %s1300_s24, %s1294_s10 }
  0x3d   : > { %v132_v15 = vcvt.s32.f32 %v124_v11  ;;  %v138_v16 = vcvt.s32.f32 %v130_v12  ;;  %v143_v19 = vmul.f32 %v1481_v17, %v131_v13  ;;  %v145_v21 = vmul.f32 %v1481_v17, %v133_v14  ;;  %p1297_p10 = pneg %p1296_p9 }
  0x3e   : > { %v134_v39 = vcvt.s32.f32 %v126_v30  ;;  %v1368_v14 = vmov 1326507024   ;;  %p1303_p3 = por %p1302_p2, %p1301_p12 }
  0x3f   : > { %v144_v20 = vmul.f32 %v1481_v17, %v132_v15  ;;  %v150_v23 = vmul.f32 %v1481_v17, %v138_v16  ;;  %v1491_v24 = vsub.f32 %v143_v19, %v1483_v18  ;;  %v1497_v26 = vsub.f32 %v145_v21, %v1483_v18 }
  0x40   : > { %v1514_v48 = vmul.f32 %v1481_v17, %v134_v39  ;;  %p1304_p4 = pnand %p1303_p3, %p1297_p10 }
  0x41   : > { %v1494_v25 = vsub.f32 %v144_v20, %v1483_v18  ;;  %v1500_v27 = vsub.f32 %v150_v23, %v1483_v18  ;;  %v163_v28 = vand.u32 2147483647, %v1491_v24  ;;  %v166_v29 = vand.u32 2139095040, %v1491_v24 }
  0x42   : > { %v372_v37 = vand.u32 2139095040, %v1497_v26  ;;  %v369_v53 = vand.u32 2147483647, %v1497_v26 }
  0x43   : > { %v266_v31 = vand.u32 2147483647, %v1494_v25  ;;  %v269_v32 = vand.u32 2139095040, %v1494_v25  ;;  %v167_v33 = vshrl.u32 %v166_v29, 23  ;;  %v170_v34 = vand.u32 8388607, %v163_v28 }
  0x44   : > { %v373_v41 = vshrl.u32 %v372_v37, 23 }
  0x45   : > { %v270_v35 = vshrl.u32 %v269_v32, 23  ;;  %v273_v36 = vand.u32 8388607, %v266_v31  ;;  %v1103_v38 = vadd.s32 4294967169, %v167_v33  ;;  %v171_v43 = vor.u32 8388608, %v170_v34 }
  0x46   : > { %v1111_v46 = vadd.s32 4294967169, %v373_v41 }
  0x47   : > { %v1107_v40 = vadd.s32 4294967169, %v270_v35  ;;  %v173_v42 = vadd.s32 1, %v1103_v38  ;;  %v274_v44 = vor.u32 8388608, %v273_v36  ;;  %v1517_v54 = vshll.u32 %v171_v43, 8 }
  0x48   : > { %v1521_v57 = vadd.s32 1, %v1111_v46 }
  0x49   : > { %v276_v45 = vadd.s32 1, %v1107_v40  ;;  %vm174_vm0 = vcmp.gt.s32.totalorder %v173_v42, 0  ;;  %v1519_v56 = vshll.u32 %v274_v44, 8 }
  0x4a   : > { %v175_v49 = vsel %vm174_vm0, %v173_v42, 0  ;;  %vm380_vm6 = vcmp.gt.s32.totalorder %v1521_v57, 0 }
  0x4b   : > { %vm277_vm1 = vcmp.gt.s32.totalorder %v276_v45, 0  ;;  %v176_v50 = vshrl.u32 %v175_v49, 5  ;;  %v177_v51 = vand.u32 31, %v175_v49 }
  0x4c   : > { %v278_v52 = vsel %vm277_vm1, %v276_v45, 0 }
  0x4d   : > { %v280_v55 = vand.u32 31, %v278_v52  ;;  %v178_v58 = vsub.s32 32, %v177_v51  ;;  %v180_v60 = vshll.u32 %v1363_v59, %v177_v51  ;;  %v183_v62 = vshll.u32 %v1364_v61, %v177_v51 }
  0x4e   : > { %v186_v0 = vshll.u32 %v1365_v63, %v177_v51  ;;  %v189_v4 = vshll.u32 %v1366_v3, %v177_v51  ;;  %v192_v7 = vshll.u32 %v1367_v6, %v177_v51  ;;  %vm195_vm2 = vcmp.lt.s32.totalorder %v176_v50, 1 }
  0x4f   : > { %v1528_v8 = vshrl.u32 %v278_v52, 5  ;;  %v179_v9 = vshrl.u32 %v1363_v59, %v178_v58  ;;  %v181_v10 = vshrl.u32 %v1364_v61, %v178_v58  ;;  %v184_v11 = vshrl.u32 %v1365_v63, %v178_v58 }
  0x50   : > { %v187_v12 = vshrl.u32 %v1366_v3, %v178_v58  ;;  %v190_v13 = vshrl.u32 %v1367_v6, %v178_v58  ;;  %v193_v15 = vshrl.u32 %v1368_v14, %v178_v58  ;;  %vm196_vm3 = vcmp.lt.s32.totalorder %v176_v50, 2 }
  0x51   : > { %vm198_vm4 = vcmp.lt.s32.totalorder %v176_v50, 4  ;;  %v182_v16 = vor.u32 %v181_v10, %v180_v60  ;;  %v185_v19 = vor.u32 %v184_v11, %v183_v62  ;;  %v281_v21 = vsub.s32 32, %v280_v55 }
  0x52   : > { %v188_v20 = vor.u32 %v187_v12, %v186_v0  ;;  %v191_v22 = vor.u32 %v190_v13, %v189_v4  ;;  %v194_v23 = vor.u32 %v193_v15, %v192_v7  ;;  %vm197_vm5 = vcmp.lt.s32.totalorder %v176_v50, 3 }
  0x53   : > { %v283_v29 = vshll.u32 %v1363_v59, %v280_v55  ;;  %v199_v30 = vsel %vm195_vm2, %v179_v9, %v182_v16  ;;  %v203_v33 = vsel %vm195_vm2, %v182_v16, %v185_v19  ;;  %v286_v38 = vshll.u32 %v1364_v61, %v280_v55 }
  0x54   : > { %v200_v32 = vsel %vm198_vm4, %v188_v20, 2102212464  ;;  %v207_v34 = vsel %vm195_vm2, %v185_v19, %v188_v20  ;;  %v204_v36 = vsel %vm198_vm4, %v191_v22, 920167782  ;;  %v208_v37 = vsel %vm198_vm4, %v194_v23, 1326507024 }
  0x55   : > { %v201_v35 = vsel %vm197_vm5, %v185_v19, %v200_v32  ;;  %v205_v39 = vsel %vm197_vm5, %v188_v20, %v204_v36  ;;  %v209_v40 = vsel %vm197_vm5, %v191_v22, %v208_v37  ;;  %v282_v41 = vshrl.u32 %v1363_v59, %v281_v21 }
  0x56   : > { %v284_v42 = vshrl.u32 %v1364_v61, %v281_v21  ;;  %v202_v43 = vsel %vm196_vm3, %v199_v30, %v201_v35  ;;  %v206_v44 = vsel %vm196_vm3, %v203_v33, %v205_v39  ;;  %v210_v45 = vsel %vm196_vm3, %v207_v34, %v209_v40 }
  0x57   : > { %v287_v46 = vshrl.u32 %v1365_v63, %v281_v21  ;;  %v1549_v49 = vmul.u32.u64.low %v1517_v54, %v210_v45  ;;  %v1550_v51 = vmul.u32.u64.high %v1517_v54, %v210_v45, %v1549_v49  ;;  %v289_v0 = vshll.u32 %v1365_v63, %v280_v55 }
  0x58   : > { %v1553_v52 = vmul.u32.u64.low %v1517_v54, %v206_v44  ;;  %v1554_v58 = vmul.u32.u64.high %v1517_v54, %v206_v44, %v1553_v52  ;;  %v285_v60 = vor.u32 %v284_v42, %v283_v29  ;;  %v290_v4 = vshrl.u32 %v1366_v3, %v281_v21 }
  0x59   : > { %v288_v62 = vor.u32 %v287_v46, %v286_v38  ;;  %v292_v50 = vshll.u32 %v1366_v3, %v280_v55  ;;  %v293_v7 = vshrl.u32 %v1367_v6, %v281_v21  ;;  %v295_v9 = vshll.u32 %v1367_v6, %v280_v55 }
  0x5a   : > { %v296_v10 = vshrl.u32 %v1368_v14, %v281_v21  ;;  %v218_v11 = vmul.u32 %v1517_v54, %v202_v43  ;;  %v291_v12 = vor.u32 %v290_v4, %v289_v0  ;;  %vm298_vm7 = vcmp.lt.s32.totalorder %v1528_v8, 1 }
  0x5b   : > { %vm299_vm8 = vcmp.lt.s32.totalorder %v1528_v8, 2  ;;  %vm220_vm9 = vc.u32 %v1550_v51, %v1553_v52  ;;  %v221_v13 = vadd.s32 1, %v1554_v58  ;;  %v294_v15 = vor.u32 %v293_v7, %v292_v50 }
  0x5c   : > { %vm300_vm10 = vcmp.lt.s32.totalorder %v1528_v8, 3  ;;  %v297_v16 = vor.u32 %v296_v10, %v295_v9  ;;  %vm301_vm11 = vcmp.lt.s32.totalorder %v1528_v8, 4  ;;  %v302_v55 = vsel %vm298_vm7, %v282_v41, %v285_v60 }
  0x5d   : > { %v306_v19 = vsel %vm298_vm7, %v285_v60, %v288_v62  ;;  %v222_v54 = vsel %vm220_vm9, %v221_v13, %v1554_v58  ;;  %v303_v20 = vsel %vm301_vm11, %v291_v12, 2102212464  ;;  %v307_v21 = vsel %vm301_vm11, %v294_v15, 920167782 }
  0x5e   : > { %v310_v22 = vsel %vm298_vm7, %v288_v62, %v291_v12  ;;  %v223_v23 = vadd.s32 %v222_v54, %v218_v11  ;;  %v304_v29 = vsel %vm300_vm10, %v288_v62, %v303_v20  ;;  %v308_v30 = vsel %vm300_vm10, %v291_v12, %v307_v21 }
  0x5f   : > { %v311_v32 = vsel %vm301_vm11, %v297_v16, 1326507024  ;;  %v305_v33 = vsel %vm299_vm8, %v302_v55, %v304_v29  ;;  %v309_v34 = vsel %vm299_vm8, %v306_v19, %v308_v30  ;;  %v381_v36 = vsel %vm380_vm6, %v1521_v57, 0 }
  0x60   : > { %v312_v35 = vsel %vm300_vm10, %v294_v15, %v311_v32  ;;  %v224_v37 = vadd.s32 536870912, %v223_v23  ;;  %v1582_v39 = vmul.u32.u64.low %v1519_v56, %v309_v34  ;;  %v1583_v40 = vmul.u32.u64.high %v1519_v56, %v309_v34, %v1582_v39 }
  0x61   : > { %v313_v38 = vsel %vm299_vm8, %v310_v22, %v312_v35  ;;  %v1588_v41 = vsub.f32 %v1514_v48, %v1483_v18  ;;  %v376_v57 = vand.u32 8388607, %v369_v53  ;;  %v119_v44 = vsub.s32 3, %v1466_v1 }
  0x62   : > { %v1591_v42 = vmul.u32.u64.low %v1519_v56, %v313_v38  ;;  %v1592_v43 = vmul.u32.u64.high %v1519_v56, %v313_v38, %v1591_v42  ;;  %v1597_v8 = vshrl.u32 %v224_v37, 30  ;;  %v383_v45 = vand.u32 31, %v381_v36 }
  0x63   : > { %v321_v46 = vmul.u32 %v1519_v56, %v305_v33  ;;  %v118_v49 = vsub.s32 2, %v1469_v2  ;;  %v324_v48 = vadd.s32 1, %v1583_v40  ;;  %v1606_v62 = vadd.s32 %v1473_v5, %v117_v47 }
  0x64   : > { %v226_v58 = vshll.u32 %v1597_v8, 30  ;;  %v384_v60 = vsub.s32 32, %v383_v45  ;;  %vm323_vm12 = vc.u32 %v1592_v43, %v1582_v39  ;;  %v377_v0 = vor.u32 8388608, %v376_v57 }
  0x65   : > { %v475_v4 = vand.u32 2139095040, %v1588_v41  ;;  %v1614_v2 = vadd.s32 %v1473_v5, %v119_v44  ;;  %v325_v50 = vsel %vm323_vm12, %v324_v48, %v1583_v40  ;;  %v382_v7 = vshrl.u32 %v381_v36, 5 }
  0x66   : > { %v1616_v56 = vsub.s32 %v223_v23, %v226_v58  ;;  %v326_v9 = vadd.s32 %v325_v50, %v321_v46  ;;  %v386_v10 = vshll.u32 %v1363_v59, %v383_v45  ;;  %v387_v11 = vshrl.u32 %v1364_v61, %v384_v60 }
  0x67   : > { %v389_v12 = vshll.u32 %v1364_v61, %v383_v45  ;;  %v390_v15 = vshrl.u32 %v1365_v63, %v384_v60  ;;  %v392_v16 = vshll.u32 %v1365_v63, %v383_v45  ;;  %v393_v55 = vshrl.u32 %v1366_v3, %v384_v60 }
  0x68   : > { %v229_v13 = vsub.s32 0, %v1616_v56  ;;  %v327_v19 = vadd.s32 536870912, %v326_v9  ;;  %v395_v54 = vshll.u32 %v1366_v3, %v383_v45  ;;  %v1627_v20 = vshll.u32 %v377_v0, 8 }
  0x69   : > { %v476_v21 = vshrl.u32 %v475_v4, 23  ;;  %v219_v22 = vadd.s32 %v1553_v52, %v1550_v51  ;;  %v385_v29 = vshrl.u32 %v1363_v59, %v384_v60  ;;  %vm404_vm13 = vcmp.lt.s32.totalorder %v382_v7, 4 }
  0x6a   : > { %v1104_v23 = vmin.u32 %v229_v13, %v1616_v56  ;;  %v1633_v30 = vshrl.u32 %v327_v19, 30  ;;  %v388_v32 = vor.u32 %v387_v11, %v386_v10  ;;  %v396_v33 = vshrl.u32 %v1367_v6, %v384_v60 }
  0x6b   : > { %v398_v34 = vshll.u32 %v1367_v6, %v383_v45  ;;  %v391_v36 = vor.u32 %v390_v15, %v389_v12  ;;  %v394_v37 = vor.u32 %v393_v55, %v392_v16  ;;  %v399_v38 = vshrl.u32 %v1368_v14, %v384_v60 }
  0x6c   : > { %v231_v35 = vclz %v1104_v23  ;;  %v329_v40 = vshll.u32 %v1633_v30, 30  ;;  %v397_v51 = vor.u32 %v396_v33, %v395_v54  ;;  %vm401_vm14 = vcmp.lt.s32.totalorder %v382_v7, 1 }
  0x6d   : > { %vm403_vm15 = vcmp.lt.s32.totalorder %v382_v7, 3  ;;  %v400_v42 = vor.u32 %v399_v38, %v398_v34  ;;  %v406_v57 = vsel %vm404_vm13, %v394_v37, 2102212464  ;;  %v1115_v46 = vadd.s32 4294967169, %v476_v21 }
  0x6e   : > { %v1105_v52 = vadd.s32 4294967294, %v231_v35  ;;  %v1640_v58 = vsub.s32 %v326_v9, %v329_v40  ;;  %vm402_vm0 = vcmp.lt.s32.totalorder %v382_v7, 2  ;;  %v405_v45 = vsel %vm401_vm14, %v385_v29, %v388_v32 }
  0x6f   : > { %v410_v48 = vsel %vm404_vm13, %v397_v51, 920167782  ;;  %v409_v60 = vsel %vm401_vm14, %v388_v32, %v391_v36  ;;  %v414_v4 = vsel %vm404_vm13, %v400_v42, 1326507024  ;;  %v407_v11 = vsel %vm403_vm15, %v391_v36, %v406_v57 }
  0x70   : > { %vm1106_vm1 = vcmp.lt.s32.totalorder %v1105_v52, 0  ;;  %v411_v0 = vsel %vm403_vm15, %v394_v37, %v410_v48  ;;  %v332_v10 = vsub.s32 0, %v1640_v58  ;;  %v413_v9 = vsel %vm401_vm14, %v391_v36, %v394_v37 }
  0x71   : > { %v234_v50 = vsel %vm1106_vm1, 0, %v1105_v52  ;;  %v415_v16 = vsel %vm403_vm15, %v397_v51, %v414_v4  ;;  %v1653_v55 = vadd.s32 %v1473_v5, %v118_v49  ;;  %v135_v19 = vcvt.s32.f32 %v1606_v62 }
  0x72   : > { %v235_v12 = vsub.s32 32, %v234_v50  ;;  %v236_v13 = vshll.u32 %v1616_v56, %v234_v50  ;;  %v239_v15 = vsub.s32 4294967266, %v234_v50  ;;  %v1108_v54 = vmin.u32 %v332_v10, %v1640_v58 }
  0x73   : > { %v412_v21 = vsel %vm402_vm0, %v409_v60, %v411_v0  ;;  %v408_v32 = vsel %vm402_vm0, %v405_v45, %v407_v11  ;;  %v416_v33 = vsel %vm402_vm0, %v413_v9, %v415_v16  ;;  %v482_v36 = vadd.s32 1, %v1115_v46 }
  0x74   : > { %v237_v23 = vshrl.u32 %v219_v22, %v235_v12  ;;  %v240_v29 = vadd.s32 127, %v239_v15  ;;  %v334_v34 = vclz %v1108_v54  ;;  %v137_v22 = vcvt.s32.f32 %v1614_v2 }
  0x75   : > { %v1661_v56 = vmul.u32.u64.low %v1627_v20, %v416_v33  ;;  %v1662_v35 = vmul.u32.u64.high %v1627_v20, %v416_v33, %v1661_v56  ;;  %v1665_v62 = vmul.u32.u64.low %v1627_v20, %v412_v21  ;;  %v1666_v37 = vmul.u32.u64.high %v1627_v20, %v412_v21, %v1665_v62 }
  0x76   : > { %v238_v5 = vor.u32 %v237_v23, %v236_v13  ;;  %v241_v49 = vshll.u32 %v240_v29, 23  ;;  %v147_v38 = vmul.f32 %v1481_v17, %v135_v19  ;;  %v1109_v40 = vadd.s32 4294967294, %v334_v34 }
  0x77   : > { %vm483_vm2 = vcmp.gt.s32.totalorder %v482_v36, 0  ;;  %v472_v52 = vand.u32 2147483647, %v1588_v41  ;;  %v322_v57 = vadd.s32 %v1582_v39, %v1592_v43  ;;  %v424_v46 = vmul.u32 %v1627_v20, %v408_v32 }
  0x78   : > { %v242_v7 = vor.u32 4788187, %v241_v49  ;;  %v245_v51 = vcvt.s32.f32 %v238_v5  ;;  %v484_v42 = vsel %vm483_vm2, %v482_v36, 0  ;;  %vm1110_vm3 = vcmp.lt.s32.totalorder %v1109_v40, 0 }
  0x79   : > { %vm426_vm4 = vc.u32 %v1662_v35, %v1665_v62  ;;  %v337_v48 = vsel %vm1110_vm3, 0, %v1109_v40  ;;  %v427_v60 = vadd.s32 1, %v1666_v37  ;;  %v486_v0 = vand.u32 31, %v484_v42 }
  0x7a   : > { %v243_v45 = vand.u32 2147483647, %v242_v7  ;;  %v136_v4 = vcvt.s32.f32 %v1653_v55  ;;  %v338_v50 = vsub.s32 32, %v337_v48  ;;  %v339_v10 = vshll.u32 %v1640_v58, %v337_v48 }
  0x7b   : > { %v342_v11 = vsub.s32 4294967266, %v337_v48  ;;  %v1681_v9 = vsub.f32 %v147_v38, %v1483_v18  ;;  %v428_v43 = vsel %vm426_vm4, %v427_v60, %v1666_v37  ;;  %v487_v20 = vsub.s32 32, %v486_v0 }
  0x7c   : > { %v246_v39 = vmul.f32 %v245_v51, %v243_v45  ;;  %vm165_vm5 = vcmp.lt.s32.totalorder %v1491_v24, 0  ;;  %v340_v12 = vshrl.u32 %v322_v57, %v338_v50  ;;  %v429_v15 = vadd.s32 %v428_v43, %v424_v46 }
  0x7d   : > { %v343_v13 = vadd.s32 127, %v342_v11  ;;  %vm1687_vm6 = vcmp.le.f32.partialorder %v163_v28, 0.7853982  ;;  %v479_v58 = vand.u32 8388607, %v472_v52  ;;  %v1693_v19 = vshrl.u32 %v484_v42, 5 }
  0x7e   : > { %v489_v54 = vshll.u32 %v1363_v59, %v486_v0  ;;  %v341_v21 = vor.u32 %v340_v12, %v339_v10  ;;  %v430_v29 = vadd.s32 536870912, %v429_v15  ;;  %v490_v32 = vshrl.u32 %v1364_v61, %v487_v20 }
  0x7f   : > { %v344_v23 = vshll.u32 %v343_v13, 23  ;;  %v247_v33 = vxor.u32 2147483648, %v246_v39  ;;  %v492_v34 = vshll.u32 %v1364_v61, %v486_v0  ;;  %v493_v28 = vshrl.u32 %v1365_v63, %v487_v20 }
  0x80   : > { %v495_v56 = vshll.u32 %v1365_v63, %v486_v0  ;;  %v348_v5 = vcvt.s32.f32 %v341_v21  ;;  %v1700_v49 = vshrl.u32 %v430_v29, 30  ;;  %v496_v37 = vshrl.u32 %v1366_v3, %v487_v20 }
  0x81   : > { %v345_v36 = vor.u32 4788187, %v344_v23  ;;  %v249_v38 = vsub.s32 4, %v1597_v8  ;;  %vm268_vm7 = vcmp.lt.s32.totalorder %v1494_v25, 0  ;;  %v480_v40 = vor.u32 8388608, %v479_v58 }
  0x82   : > { %v498_v7 = vshll.u32 %v1366_v3, %v486_v0  ;;  %v499_v51 = vshrl.u32 %v1367_v6, %v487_v20  ;;  %v432_v57 = vshll.u32 %v1700_v49, 30  ;;  %v491_v46 = vor.u32 %v490_v32, %v489_v54 }
  0x83   : > { %v346_v42 = vand.u32 2147483647, %v345_v36  ;;  %vm504_vm8 = vcmp.lt.s32.totalorder %v1693_v19, 1  ;;  %v494_v45 = vor.u32 %v493_v28, %v492_v34  ;;  %v501_v60 = vshll.u32 %v1367_v6, %v486_v0 }
  0x84   : > { %v500_v48 = vor.u32 %v499_v51, %v498_v7  ;;  %v502_v50 = vshrl.u32 %v1368_v14, %v487_v20  ;;  %v248_v10 = vsel %vm165_vm5, %v247_v33, %v246_v39  ;;  %v1713_v43 = vsub.s32 %v429_v15, %v432_v57 }
  0x85   : > { %v349_v11 = vmul.f32 %v348_v5, %v346_v42  ;;  %v497_v12 = vor.u32 %v496_v37, %v495_v56  ;;  %vm1717_vm9 = vcmp.le.f32.partialorder %v266_v31, 0.7853982  ;;  %v488_v58 = vshrl.u32 %v1363_v59, %v487_v20 }
  0x86   : > { %vm507_vm10 = vcmp.lt.s32.totalorder %v1693_v19, 4  ;;  %v520_v0 = vshll.u32 %v480_v40, 8  ;;  %v435_v54 = vsub.s32 0, %v1713_v43  ;;  %v503_v21 = vor.u32 %v502_v50, %v501_v60 }
  0x87   : > { %vm506_vm11 = vcmp.lt.s32.totalorder %v1693_v19, 3  ;;  %v509_v39 = vsel %vm507_vm10, %v497_v12, 2102212464  ;;  %v251_v31 = vsel %vm1687_vm6, %v1491_v24, %v248_v10  ;;  %vm505_vm12 = vcmp.lt.s32.totalorder %v1693_v19, 2 }
  0x88   : > { %v512_v20 = vsel %vm504_vm8, %v491_v46, %v494_v45  ;;  %v513_v15 = vsel %vm507_vm10, %v500_v48, 920167782  ;;  %v250_v23 = vsel %vm165_vm5, %v249_v38, %v1597_v8  ;;  %v350_v29 = vxor.u32 2147483648, %v349_v11 }
  0x89   : > { %v352_v32 = vsub.s32 4, %v1633_v30  ;;  %v1112_v33 = vmin.u32 %v435_v54, %v1713_v43  ;;  %v508_v34 = vsel %vm504_vm8, %v488_v58, %v491_v46  ;;  %v510_v28 = vsel %vm506_vm11, %v494_v45, %v509_v39 }
  0x8a   : > { %v514_v56 = vsel %vm506_vm11, %v497_v12, %v513_v15  ;;  %v516_v36 = vsel %vm504_vm8, %v494_v45, %v497_v12  ;;  %1233 = vcosq.f32 %v251_v31  ;;  %v517_v37 = vsel %vm507_vm10, %v503_v21, 1326507024 }
  0x8b   : > { %v437_v5 = vclz %v1112_v33  ;;  %v515_v8 = vsel %vm505_vm12, %v512_v20, %v514_v56  ;;  %1235 = vsinq.f32 %v251_v31  ;;  %v518_v38 = vsel %vm506_vm11, %v500_v48, %v517_v37 }
  0x8c   : > { %v1754_v40 = vmul.u32.u64.low %v520_v0, %v515_v8  ;;  %v1755_v7 = vmul.u32.u64.high %v520_v0, %v515_v8, %v1754_v40  ;;  %v351_v51 = vsel %vm268_vm7, %v350_v29, %v349_v11  ;;  %v511_v57 = vsel %vm505_vm12, %v508_v34, %v510_v28 }
  0x8d   : > { %v1113_v42 = vadd.s32 4294967294, %v437_v5  ;;  %v519_v46 = vsel %vm505_vm12, %v516_v36, %v518_v38  ;;  %v148_v45 = vmul.f32 %v1481_v17, %v136_v4  ;;  %v149_v48 = vmul.f32 %v1481_v17, %v137_v22 }
  0x8e   : > { %v1770_v60 = vmul.u32.u64.low %v520_v0, %v519_v46  ;;  %v1771_v50 = vmul.u32.u64.high %v520_v0, %v519_v46, %v1770_v60  ;;  %v252_v10 = vsel %vm1687_vm6, 0, %v250_v23  ;;  %v425_v11 = vadd.s32 %v1665_v62, %v1662_v35 }
  0x8f   : > { %vm1114_vm13 = vcmp.lt.s32.totalorder %v1113_v42, 0  ;;  %v578_v19 = vand.u32 2139095040, %v1681_v9  ;;  %v354_v55 = vsel %vm1717_vm9, %v1494_v25, %v351_v51  ;;  %v527_v2 = vmul.u32 %v520_v0, %v511_v57 }
  0x90   : > { %v440_v4 = vsel %vm1114_vm13, 0, %v1113_v42  ;;  %v530_v17 = vadd.s32 1, %v1755_v7  ;;  %v353_v22 = vsel %vm268_vm7, %v352_v32, %v1633_v30  ;;  %v455_v35 = vsub.s32 4, %v1700_v49 }
  0x91   : > { %v441_v16 = vsub.s32 32, %v440_v4  ;;  %v442_v12 = vshll.u32 %v1713_v43, %v440_v4  ;;  %v445_v58 = vsub.s32 4294967266, %v440_v4  ;;  %vm529_vm14 = vc.u32 %v1771_v50, %v1754_v40 }
  0x92   : > { %v575_v62 = vand.u32 2147483647, %v1681_v9  ;;  %v579_v54 = vshrl.u32 %v578_v19, 23  ;;  %1237 = vcosq.f32 %v354_v55  ;;  %v531_v39 = vsel %vm529_vm14, %v530_v17, %v1755_v7 }
  0x93   : > { %v443_v0 = vshrl.u32 %v425_v11, %v441_v16  ;;  %v446_v21 = vadd.s32 127, %v445_v58  ;;  %v1792_v31 = vsub.f32 %v148_v45, %v1483_v18  ;;  %v532_v30 = vadd.s32 %v531_v39, %v527_v2 }
  0x94   : > { %v1119_v20 = vadd.s32 4294967169, %v579_v54  ;;  %v1234_v43 = vpop.eup %1233  ;;  %v1795_v15 = vsub.f32 %v149_v48, %v1483_v18  ;;  %v1797_v23 = vand.u32 3, %v252_v10  ;;  %v355_v34 = vsel %vm1717_vm9, 0, %v353_v22 }
  0x95   : > { %v444_v29 = vor.u32 %v443_v0, %v442_v12  ;;  %v447_v32 = vshll.u32 %v446_v21, 23  ;;  %v1236_v33 = vpop.eup %1235  ;;  %vm371_vm15 = vcmp.lt.s32.totalorder %v1497_v26, 0  ;;  %v533_v28 = vadd.s32 536870912, %v532_v30 }
  0x96   : > { %v585_v56 = vadd.s32 1, %v1119_v20  ;;  %v1805_v8 = vsel %vm371_vm15, %v455_v35, %v1700_v49  ;;  %v582_v18 = vand.u32 8388607, %v575_v62  ;;  %v262_v37 = vxor.u32 2147483648, %v1234_v43 }
  0x97   : > { %v448_v36 = vor.u32 4788187, %v447_v32  ;;  %v451_v5 = vcvt.s32.f32 %v444_v29  ;;  %v1809_v38 = vshrl.u32 %v533_v28, 30  ;;  %v681_v13 = vand.u32 2139095040, %v1792_v31 }
  0x98   : > { %vm586_vm0 = vcmp.gt.s32.totalorder %v585_v56, 0  ;;  %v259_v7 = vxor.u32 2147483648, %v1236_v33  ;;  %vm261_vm1 = vcmp.eq.s32.totalorder %v1797_v23, 2  ;;  %vm258_vm2 = vcmp.eq.s32.totalorder %v1797_v23, 0 }
  0x99   : > { %v449_v51 = vand.u32 2147483647, %v448_v36  ;;  %v587_v42 = vsel %vm586_vm0, %v585_v56, 0  ;;  %v1814_v57 = vand.u32 3, %v355_v34  ;;  %vm1818_vm3 = vcmp.le.f32.partialorder %v369_v53, 0.7853982 }
  0x9a   : > { %v535_v46 = vshll.u32 %v1809_v38, 30  ;;  %v458_v48 = vsel %vm1818_vm3, 0, %v1805_v8  ;;  %v583_v60 = vor.u32 8388608, %v582_v18  ;;  %v589_v10 = vand.u32 31, %v587_v42 }
  0x9b   : > { %v452_v45 = vmul.f32 %v451_v5, %v449_v51  ;;  %v1826_v11 = vsel %vm261_vm1, %v262_v37, %v1236_v33  ;;  %1239 = vsinq.f32 %v354_v55  ;;  %v682_v4 = vshrl.u32 %v681_v13, 23 }
  0x9c   : > { %v1828_v19 = vsub.s32 %v532_v30, %v535_v46  ;;  %v1830_v2 = vpop.eup %1237  ;;  %v1832_v53 = vsel %vm258_vm2, %v1234_v43, %v259_v7  ;;  %v588_v17 = vshrl.u32 %v587_v42, 5  ;;  %v590_v22 = vsub.s32 32, %v589_v10 }
  0x9d   : > { %v592_v16 = vshll.u32 %v1363_v59, %v589_v10  ;;  %v528_v12 = vadd.s32 %v1754_v40, %v1771_v50  ;;  %v595_v35 = vshll.u32 %v1364_v61, %v589_v10  ;;  %v678_v55 = vand.u32 2147483647, %v1792_v31 }
  0x9e   : > { %v538_v58 = vsub.s32 0, %v1828_v19  ;;  %v453_v54 = vxor.u32 2147483648, %v452_v45  ;;  %v593_v0 = vshrl.u32 %v1364_v61, %v590_v22  ;;  %v596_v21 = vshrl.u32 %v1365_v63, %v590_v22 }
  0x9f   : > { %v1842_v39 = vshll.u32 %v583_v60, 8  ;;  %v365_v30 = vxor.u32 2147483648, %v1830_v2  ;;  %v598_v43 = vshll.u32 %v1365_v63, %v589_v10  ;;  %v1123_v40 = vadd.s32 4294967169, %v682_v4 }
  0xa0   : > { %v1116_v20 = vmin.u32 %v538_v58, %v1828_v19  ;;  %v591_v50 = vshrl.u32 %v1363_v59, %v590_v22  ;;  %v594_v29 = vor.u32 %v593_v0, %v592_v16  ;;  %v597_v32 = vor.u32 %v596_v21, %v595_v35 }
  0xa1   : > { %vm607_vm4 = vcmp.lt.s32.totalorder %v588_v17, 1  ;;  %vm257_vm5 = vcmp.lt.s32.totalorder %v1797_v23, 2  ;;  %v599_v34 = vshrl.u32 %v1366_v3, %v590_v22  ;;  %v601_v28 = vshll.u32 %v1366_v3, %v589_v10 }
  0xa2   : > { %v540_v33 = vclz %v1116_v20  ;;  %vm608_vm6 = vcmp.lt.s32.totalorder %v588_v17, 2  ;;  %v454_v56 = vsel %vm371_vm15, %v453_v54, %v452_v45  ;;  %v602_v36 = vshrl.u32 %v1367_v6, %v590_v22 }
  0xa3   : > { %v604_v5 = vshll.u32 %v1367_v6, %v589_v10  ;;  %v605_v18 = vshrl.u32 %v1368_v14, %v590_v22  ;;  %vm364_vm7 = vcmp.eq.s32.totalorder %v1814_v57, 2  ;;  %v600_v13 = vor.u32 %v599_v34, %v598_v43 }
  0xa4   : > { %v1117_v37 = vadd.s32 4294967294, %v540_v33  ;;  %vm609_vm8 = vcmp.lt.s32.totalorder %v588_v17, 3  ;;  %vm610_vm9 = vcmp.lt.s32.totalorder %v588_v17, 4  ;;  %v603_v7 = vor.u32 %v602_v36, %v601_v28 }
  0xa5   : > { %v606_v51 = vor.u32 %v605_v18, %v604_v5  ;;  %v611_v42 = vsel %vm607_vm4, %v591_v50, %v594_v29  ;;  %v615_v46 = vsel %vm607_vm4, %v594_v29, %v597_v32  ;;  %v1859_v60 = vpop.eup %1239  ;;  %v612_v45 = vsel %vm610_vm9, %v600_v13, 2102212464 }
  0xa6   : > { %vm1118_vm10 = vcmp.lt.s32.totalorder %v1117_v37, 0  ;;  %v619_v10 = vsel %vm607_vm4, %v597_v32, %v600_v13  ;;  %v688_v4 = vadd.s32 1, %v1123_v40  ;;  %vm474_vm11 = vcmp.lt.s32.totalorder %v1588_v41, 0 }
  0xa7   : > { %v543_v22 = vsel %vm1118_vm10, 0, %v1117_v37  ;;  %v613_v16 = vsel %vm609_vm8, %v597_v32, %v612_v45  ;;  %v616_v58 = vsel %vm610_vm9, %v603_v7, 920167782  ;;  %v620_v35 = vsel %vm610_vm9, %v606_v51, 1326507024 }
  0xa8   : > { %v457_v54 = vsel %vm1818_vm3, %v1497_v26, %v454_v56  ;;  %v544_v0 = vsub.s32 32, %v543_v22  ;;  %v545_v21 = vshll.u32 %v1828_v19, %v543_v22  ;;  %v548_v20 = vsub.s32 4294967266, %v543_v22 }
  0xa9   : > { %v614_v43 = vsel %vm608_vm6, %v611_v42, %v613_v16  ;;  %v617_v50 = vsel %vm609_vm8, %v600_v13, %v616_v58  ;;  %v621_v40 = vsel %vm609_vm8, %v603_v7, %v620_v35  ;;  %vm689_vm12 = vcmp.gt.s32.totalorder %v688_v4, 0 }
  0xaa   : > { %v546_v29 = vshrl.u32 %v528_v12, %v544_v0  ;;  %v549_v33 = vadd.s32 127, %v548_v20  ;;  %v618_v32 = vsel %vm608_vm6, %v615_v46, %v617_v50  ;;  %v622_v34 = vsel %vm608_vm6, %v619_v10, %v621_v40 }
  0xab   : > { %v1874_v28 = vmul.u32.u64.low %v1842_v39, %v622_v34  ;;  %v1875_v56 = vmul.u32.u64.high %v1842_v39, %v622_v34, %v1874_v28  ;;  %v1878_v19 = vmul.u32.u64.low %v1842_v39, %v618_v32  ;;  %v1879_v36 = vmul.u32.u64.high %v1842_v39, %v618_v32, %v1878_v19 }
  0xac   : > { %vm361_vm13 = vcmp.eq.s32.totalorder %v1814_v57, 0  ;;  %vm1885_vm14 = vcmp.le.f32.partialorder %v472_v52, 0.7853982  ;;  %v547_v5 = vor.u32 %v546_v29, %v545_v21  ;;  %v550_v17 = vshll.u32 %v549_v33, 23 }
  0xad   : > { %v558_v18 = vsub.s32 4, %v1809_v38  ;;  %v690_v37 = vsel %vm689_vm12, %v688_v4, 0  ;;  %v1894_v13 = vsel %vm257_vm5, %v1832_v53, %v1826_v11  ;;  %1241 = vcosq.f32 %v457_v54 }
  0xae   : > { %v1900_v52 = vand.u32 3, %v458_v48  ;;  %v692_v7 = vand.u32 31, %v690_v37  ;;  %1243 = vsinq.f32 %v457_v54  ;;  %v551_v51 = vor.u32 4788187, %v550_v17 }
  0xaf   : > { %v554_v42 = vcvt.s32.f32 %v547_v5  ;;  %v630_v46 = vmul.u32 %v1842_v39, %v614_v43  ;;  %v362_v45 = vxor.u32 2147483648, %v1859_v60  ;;  %v1909_v23 = vsel %vm364_vm7, %v365_v30, %v1859_v60 }
  0xb0   : > { %vm632_vm15 = vc.u32 %v1875_v56, %v1878_v19  ;;  %v633_v8 = vadd.s32 1, %v1879_v36  ;;  %v552_v49 = vand.u32 2147483647, %v551_v51  ;;  %v1917_v48 = vsel %vm474_vm11, %v558_v18, %v1809_v38 }
  0xb1   : > { %v685_v11 = vand.u32 8388607, %v678_v55  ;;  %v693_v53 = vsub.s32 32, %v692_v7  ;;  %v1922_v10 = vshrl.u32 %v690_v37, 5  ;;  %v695_v30 = vshll.u32 %v1363_v59, %v692_v7 }
  0xb2   : > { %v634_v39 = vsel %vm632_vm15, %v633_v8, %v1879_v36  ;;  %v698_v60 = vshll.u32 %v1364_v61, %v692_v7  ;;  %v555_v4 = vmul.f32 %v554_v42, %v552_v49  ;;  %v701_v58 = vshll.u32 %v1365_v63, %v692_v7 }
  0xb3   : > { %v635_v22 = vadd.s32 %v634_v39, %v630_v46  ;;  %v696_v16 = vshrl.u32 %v1364_v61, %v693_v53  ;;  %vm255_vm0 = vweird.f32 %v1491_v24  ;;  %v699_v38 = vshrl.u32 %v1365_v63, %v693_v53 }
  0xb4   : > { %v702_v35 = vshrl.u32 %v1366_v3, %v693_v53  ;;  %v704_v54 = vshll.u32 %v1366_v3, %v692_v7  ;;  %v705_v0 = vshrl.u32 %v1367_v6, %v693_v53  ;;  %vm360_vm1 = vcmp.lt.s32.totalorder %v1814_v57, 2 }
  0xb5   : > { %v556_v21 = vxor.u32 2147483648, %v555_v4  ;;  %v636_v20 = vadd.s32 536870912, %v635_v22  ;;  %v686_v43 = vor.u32 8388608, %v685_v11  ;;  %v707_v50 = vshll.u32 %v1367_v6, %v692_v7 }
  0xb6   : > { %v697_v40 = vor.u32 %v696_v16, %v695_v30  ;;  %v700_v29 = vor.u32 %v699_v38, %v698_v60  ;;  %v706_v33 = vor.u32 %v705_v0, %v704_v54  ;;  %v708_v32 = vshrl.u32 %v1368_v14, %v693_v53 }
  0xb7   : > { %vm464_vm2 = vcmp.eq.s32.totalorder %v1900_v52, 0  ;;  %vm467_vm3 = vcmp.eq.s32.totalorder %v1900_v52, 2  ;;  %v557_v34 = vsel %vm474_vm11, %v556_v21, %v555_v4  ;;  %v637_v28 = vshrl.u32 %v636_v20, 30  ;;  %v1242_v5 = vpop.eup %1241 }
  0xb8   : > { %v703_v36 = vor.u32 %v702_v35, %v701_v58  ;;  %vm710_vm4 = vcmp.lt.s32.totalorder %v1922_v10, 1  ;;  %vm358_vm5 = vweird.f32 %v1494_v25  ;;  %v363_v17 = vsel %vm361_vm13, %v1830_v2, %v362_v45  ;;  %v1244_v37 = vpop.eup %1243 }
  0xb9   : > { %v560_v18 = vsel %vm1885_vm14, %v1588_v41, %v557_v34  ;;  %vm712_vm6 = vcmp.lt.s32.totalorder %v1922_v10, 3  ;;  %vm713_vm7 = vcmp.lt.s32.totalorder %v1922_v10, 4  ;;  %v638_v7 = vshll.u32 %v637_v28, 30 }
  0xba   : > { %v694_v51 = vshrl.u32 %v1363_v59, %v693_v53  ;;  %v709_v42 = vor.u32 %v708_v32, %v707_v50  ;;  %vm711_vm8 = vcmp.lt.s32.totalorder %v1922_v10, 2  ;;  %vm463_vm9 = vcmp.lt.s32.totalorder %v1900_v52, 2 }
  0xbb   : > { %v561_v2 = vsel %vm1885_vm14, 0, %v1917_v48  ;;  %v718_v46 = vsel %vm710_vm4, %v697_v40, %v700_v29  ;;  %v719_v45 = vsel %vm713_vm7, %v706_v33, 920167782  ;;  %v726_v8 = vshll.u32 %v686_v43, 8 }
  0xbc   : > { %1245 = vcosq.f32 %v560_v18  ;;  %v1960_v49 = vsub.s32 %v635_v22, %v638_v7  ;;  %v715_v11 = vsel %vm713_vm7, %v703_v36, 2102212464  ;;  %v720_v53 = vsel %vm712_vm6, %v703_v36, %v719_v45 }
  0xbd   : > { %v465_v39 = vxor.u32 2147483648, %v1244_v37  ;;  %v468_v30 = vxor.u32 2147483648, %v1242_v5  ;;  %1247 = vsinq.f32 %v560_v18  ;;  %v721_v12 = vsel %vm711_vm8, %v718_v46, %v720_v53 }
  0xbe   : > { %vm1970_vm10 = vcmp.le.f32.partialorder %v575_v62, 0.7853982  ;;  %v641_v60 = vsub.s32 0, %v1960_v49  ;;  %v714_v4 = vsel %vm710_vm4, %v694_v51, %v697_v40  ;;  %v722_v22 = vsel %vm710_vm4, %v700_v29, %v703_v36 }
  0xbf   : > { %v723_v16 = vsel %vm713_vm7, %v709_v42, 1326507024  ;;  %v716_v58 = vsel %vm712_vm6, %v700_v29, %v715_v11  ;;  %v1985_v38 = vmul.u32.u64.low %v726_v8, %v721_v12  ;;  %v1986_v35 = vmul.u32.u64.high %v726_v8, %v721_v12, %v1985_v38 }
  0xc0   : > { %v724_v62 = vsel %vm712_vm6, %v706_v33, %v723_v16  ;;  %v1992_v54 = vsel %vm255_vm0, nan, %v1894_v13  ;;  %vm461_vm11 = vweird.f32 %v1497_v26  ;;  %vm577_vm12 = vcmp.lt.s32.totalorder %v1681_v9, 0 }
  0xc1   : > { %v1120_v0 = vmin.u32 %v641_v60, %v1960_v49  ;;  %v661_v21 = vsub.s32 4, %v637_v28  ;;  %v367_v20 = vsel %vm360_vm1, %v363_v17, %v1909_v23  ;;  %v2000_v43 = vand.u32 3, %v561_v2 }
  0xc2   : > { %v725_v50 = vsel %vm711_vm8, %v722_v22, %v724_v62  ;;  %v784_v24 = vand.u32 2139095040, %v1795_v15  ;;  %v717_v40 = vsel %vm711_vm8, %v714_v4, %v716_v58  ;;  %v466_v32 = vsel %vm464_vm2, %v1242_v5, %v465_v39 }
  0xc3   : > { %v643_v13 = vclz %v1120_v0  ;;  %v2007_v29 = vmul.u32.u64.low %v726_v8, %v725_v50  ;;  %v2008_v33 = vmul.u32.u64.high %v726_v8, %v725_v50, %v2007_v29  ;;  %v469_v57 = vsel %vm467_vm3, %v468_v30, %v1244_v37 }
  0xc4   : > { %v736_v23 = vadd.s32 1, %v1986_v35  ;;  %v785_v34 = vshrl.u32 %v784_v24, 23  ;;  %v2017_v36 = vsel %vm358_vm5, nan, %v367_v20  ;;  %v662_v10 = vsel %vm577_vm12, %v661_v21, %v637_v28 }
  0xc5   : > { %v1121_v17 = vadd.s32 4294967294, %v643_v13  ;;  %v781_v18 = vand.u32 2147483647, %v1795_v15  ;;  %vm567_vm13 = vcmp.eq.s32.totalorder %v2000_v43, 0  ;;  %vm570_vm14 = vcmp.eq.s32.totalorder %v2000_v43, 2 }
  0xc6   : > { %v733_v5 = vmul.u32 %v726_v8, %v717_v40  ;;  %v1127_v7 = vadd.s32 4294967169, %v785_v34  ;;  %v1246_v37 = vpop.eup %1245  ;;  %v470_v51 = vsel %vm463_vm9, %v466_v32, %v469_v57  ;;  %v631_v25 = vadd.s32 %v1878_v19, %v1875_v56 }
  0xc7   : > { %vm1122_vm15 = vcmp.lt.s32.totalorder %v1121_v17, 0  ;;  %vm735_vm0 = vc.u32 %v2008_v33, %v1985_v38  ;;  %v1248_v28 = vpop.eup %1247  ;;  %vm566_vm1 = vcmp.lt.s32.totalorder %v2000_v43, 2  ;;  %v664_v2 = vsel %vm1970_vm10, 0, %v662_v10 }
  0xc8   : > { %v646_v42 = vsel %vm1122_vm15, 0, %v1121_v17  ;;  %v737_v46 = vsel %vm735_vm0, %v736_v23, %v1986_v35  ;;  %v791_v45 = vadd.s32 1, %v1127_v7  ;;  %v788_v56 = vand.u32 8388607, %v781_v18 }
  0xc9   : > { %v647_v8 = vsub.s32 32, %v646_v42  ;;  %v648_v52 = vshll.u32 %v1960_v49, %v646_v42  ;;  %v651_v11 = vsub.s32 4294967266, %v646_v42  ;;  %v571_v19 = vxor.u32 2147483648, %v1246_v37 }
  0xca   : > { %v738_v53 = vadd.s32 %v737_v46, %v733_v5  ;;  %vm792_vm2 = vcmp.gt.s32.totalorder %v791_v45, 0  ;;  %v884_v39 = vand.u32 2147483647, %v1500_v27  ;;  %v568_v30 = vxor.u32 2147483648, %v1248_v28 }
  0xcb   : > { %v649_v12 = vshrl.u32 %v631_v25, %v647_v8  ;;  %v652_v60 = vadd.s32 127, %v651_v11  ;;  %v793_v4 = vsel %vm792_vm2, %v791_v45, 0  ;;  %v2040_v22 = vsel %vm461_vm11, nan, %v470_v51 }
  0xcc   : > { %v2042_v16 = vand.u32 3, %v664_v2  ;;  %v739_v49 = vadd.s32 536870912, %v738_v53  ;;  %v795_v58 = vand.u32 31, %v793_v4  ;;  %v789_v0 = vor.u32 8388608, %v788_v56 }
  0xcd   : > { %v650_v62 = vor.u32 %v649_v12, %v648_v52  ;;  %v653_v35 = vshll.u32 %v652_v60, 23  ;;  %v887_v21 = vand.u32 2139095040, %v1500_v27  ;;  %v572_v20 = vsel %vm570_vm14, %v571_v19, %v1248_v28 }
  0xce   : > { %v2047_v50 = vshrl.u32 %v739_v49, 30  ;;  %v796_v24 = vsub.s32 32, %v795_v58  ;;  %v2051_v26 = vand.u32 8388607, %v884_v39  ;;  %v569_v13 = vsel %vm567_vm13, %v1246_v37, %v568_v30 }
  0xcf   : > { %v654_v40 = vor.u32 4788187, %v653_v35  ;;  %v657_v29 = vcvt.s32.f32 %v650_v62  ;;  %v2055_v32 = vshrl.u32 %v793_v4, 5  ;;  %v798_v23 = vshll.u32 %v1363_v59, %v795_v58 }
  0xd0   : > { %v741_v57 = vshll.u32 %v2047_v50, 30  ;;  %v799_v34 = vshrl.u32 %v1364_v61, %v796_v24  ;;  %v801_v17 = vshll.u32 %v1364_v61, %v795_v58  ;;  %v802_v5 = vshrl.u32 %v1365_v63, %v796_v24 }
  0xd1   : > { %v655_v10 = vand.u32 2147483647, %v654_v40  ;;  %v807_v7 = vshll.u32 %v1366_v3, %v795_v58  ;;  %v808_v51 = vshrl.u32 %v1367_v6, %v796_v24  ;;  %v734_v37 = vadd.s32 %v1985_v38, %v2008_v33 }
  0xd2   : > { %v2066_v25 = vsub.s32 %v738_v53, %v741_v57  ;;  %v804_v28 = vshll.u32 %v1365_v63, %v795_v58  ;;  %v805_v42 = vshrl.u32 %v1366_v3, %v796_v24  ;;  %v573_v2 = vsel %vm566_vm1, %v569_v13, %v572_v20 }
  0xd3   : > { %v658_v46 = vmul.f32 %v657_v29, %v655_v10  ;;  %v810_v45 = vshll.u32 %v1367_v6, %v795_v58  ;;  %v2073_v8 = vshll.u32 %v789_v0, 8  ;;  %v800_v11 = vor.u32 %v799_v34, %v798_v23 }
  0xd4   : > { %v744_v52 = vsub.s32 0, %v2066_v25  ;;  %v803_v56 = vor.u32 %v802_v5, %v801_v17  ;;  %v811_v38 = vshrl.u32 %v1368_v14, %v796_v24  ;;  %v797_v19 = vshrl.u32 %v1363_v59, %v796_v24 }
  0xd5   : > { %v659_v33 = vxor.u32 2147483648, %v658_v46  ;;  %v809_v53 = vor.u32 %v808_v51, %v807_v7  ;;  %vm813_vm3 = vcmp.lt.s32.totalorder %v2055_v32, 1  ;;  %vm564_vm4 = vweird.f32 %v1588_v41 }
  0xd6   : > { %vm680_vm5 = vcmp.lt.s32.totalorder %v1792_v31, 0  ;;  %v1124_v43 = vmin.u32 %v744_v52, %v2066_v25  ;;  %v806_v30 = vor.u32 %v805_v42, %v804_v28  ;;  %vm814_vm6 = vcmp.lt.s32.totalorder %v2055_v32, 2 }
  0xd7   : > { %v888_v12 = vshrl.u32 %v887_v21, 23  ;;  %v660_v60 = vsel %vm577_vm12, %v659_v33, %v658_v46  ;;  %v812_v4 = vor.u32 %v811_v38, %v810_v45  ;;  %vm815_vm7 = vcmp.lt.s32.totalorder %v2055_v32, 3 }
  0xd8   : > { %vm816_vm8 = vcmp.lt.s32.totalorder %v2055_v32, 4  ;;  %v663_v49 = vsel %vm1970_vm10, %v1681_v9, %v660_v60  ;;  %v746_v58 = vclz %v1124_v43  ;;  %v821_v35 = vsel %vm813_vm3, %v800_v11, %v803_v56 }
  0xd9   : > { %v818_v62 = vsel %vm816_vm8, %v806_v30, 2102212464  ;;  %1249 = vcosq.f32 %v663_v49  ;;  %vm2096_vm9 = vcmp.le.f32.partialorder %v678_v55, 0.7853982  ;;  %v764_v21 = vsub.s32 4, %v2047_v50 }
  0xda   : > { %v817_v48 = vsel %vm813_vm3, %v797_v19, %v800_v11  ;;  %v822_v20 = vsel %vm816_vm8, %v809_v53, 920167782  ;;  %1251 = vsinq.f32 %v663_v49  ;;  %v1125_v24 = vadd.s32 4294967294, %v746_v58 }
  0xdb   : > { %v823_v13 = vsel %vm815_vm7, %v806_v30, %v822_v20  ;;  %v825_v40 = vsel %vm813_vm3, %v803_v56, %v806_v30  ;;  %v819_v55 = vsel %vm815_vm7, %v803_v56, %v818_v62  ;;  %v826_v57 = vsel %vm816_vm8, %v812_v4, 1326507024 }
  0xdc   : > { %v824_v29 = vsel %vm814_vm6, %v821_v35, %v823_v13  ;;  %v1131_v23 = vadd.s32 4294967169, %v888_v12  ;;  %vm670_vm10 = vcmp.eq.s32.totalorder %v2042_v16, 0  ;;  %vm1126_vm11 = vcmp.lt.s32.totalorder %v1125_v24, 0 }
  0xdd   : > { %v827_v34 = vsel %vm815_vm7, %v809_v53, %v826_v57  ;;  %v2119_v17 = vmul.u32.u64.low %v2073_v8, %v824_v29  ;;  %v2120_v10 = vmul.u32.u64.high %v2073_v8, %v824_v29, %v2119_v17  ;;  %vm669_vm12 = vcmp.lt.s32.totalorder %v2042_v16, 2 }
  0xde   : > { %v749_v5 = vsel %vm1126_vm11, 0, %v1125_v24  ;;  %v828_v7 = vsel %vm814_vm6, %v825_v40, %v827_v34  ;;  %v892_v51 = vor.u32 8388608, %v2051_v26  ;;  %v894_v28 = vadd.s32 1, %v1131_v23 }
  0xdf   : > { %v750_v42 = vsub.s32 32, %v749_v5  ;;  %v751_v46 = vshll.u32 %v2066_v25, %v749_v5  ;;  %v754_v45 = vsub.s32 4294967266, %v749_v5  ;;  %v820_v52 = vsel %vm814_vm6, %v817_v48, %v819_v55 }
  0xe0   : > { %v2133_v11 = vsel %vm680_vm5, %v764_v21, %v2047_v50  ;;  %v2136_v56 = vmul.u32.u64.low %v2073_v8, %v828_v7  ;;  %v2137_v38 = vmul.u32.u64.high %v2073_v8, %v828_v7, %v2136_v56  ;;  %vm895_vm13 = vcmp.gt.s32.totalorder %v894_v28, 0 }
  0xe1   : > { %vm667_vm14 = vweird.f32 %v1681_v9  ;;  %v752_v26 = vshrl.u32 %v734_v37, %v750_v42  ;;  %v755_v33 = vadd.s32 127, %v754_v45  ;;  %v839_v25 = vadd.s32 1, %v2120_v10 }
  0xe2   : > { %v896_v19 = vsel %vm895_vm13, %v894_v28, 0  ;;  %v2143_v32 = vsel %vm564_vm4, nan, %v573_v2  ;;  %vm673_vm15 = vcmp.eq.s32.totalorder %v2042_v16, 2  ;;  %v836_v50 = vmul.u32 %v2073_v8, %v820_v52  ;;  %v1265_v2 = vld [vmem:[#allocation2] sm:$0xf] }
  0xe3   : > { %v898_v53 = vand.u32 31, %v896_v19  ;;  %v753_v43 = vor.u32 %v752_v26, %v751_v46  ;;  %v756_v30 = vshll.u32 %v755_v33, 23  ;;  %v767_v12 = vsel %vm2096_vm9, 0, %v2133_v11  ;;  %v1250_v60 = vpop.eup %1249 }
  0xe4   : > { %v2150_v37 = vshll.u32 %v892_v51, 8  ;;  %vm838_vm0 = vc.u32 %v2137_v38, %v2119_v17  ;;  %v2156_v4 = vrot.slane %v1265_v2, %v117_v47  ;;  %v2160_v8 = vrot.slane %v1265_v2, %v119_v44  ;;  %v1252_v49 = vpop.eup %1251 }
  0xe5   : > { %v899_v41 = vsub.s32 32, %v898_v53  ;;  %v674_v58 = vxor.u32 2147483648, %v1250_v60  ;;  %v757_v62 = vor.u32 4788187, %v756_v30  ;;  %v760_v35 = vcvt.s32.f32 %v753_v43 }
  0xe6   : > { %v840_v21 = vsel %vm838_vm0, %v839_v25, %v2120_v10  ;;  %v671_v48 = vxor.u32 2147483648, %v1252_v49  ;;  %v897_v24 = vshrl.u32 %v896_v19, 5  ;;  %v901_v13 = vshll.u32 %v1363_v59, %v898_v53 }
  0xe7   : > { %v841_v20 = vadd.s32 %v840_v21, %v836_v50  ;;  %v675_v40 = vsel %vm673_vm15, %v674_v58, %v1252_v49  ;;  %v758_v47 = vand.u32 2147483647, %v757_v62  ;;  %v904_v55 = vshll.u32 %v1364_v61, %v898_v53 }
  0xe8   : > { %v905_v1 = vshrl.u32 %v1365_v63, %v899_v41  ;;  %v672_v44 = vsel %vm670_vm10, %v1250_v60, %v671_v48  ;;  %v902_v57 = vshrl.u32 %v1364_v61, %v899_v41  ;;  %v907_v23 = vshll.u32 %v1365_v63, %v898_v53 }
  0xe9   : > { %v842_v29 = vadd.s32 536870912, %v841_v20  ;;  %v676_v34 = vsel %vm669_vm12, %v672_v44, %v675_v40  ;;  %v761_v10 = vmul.f32 %v760_v35, %v758_v47  ;;  %v908_v7 = vshrl.u32 %v1366_v3, %v899_v41 }
  0xea   : > { %v906_v5 = vor.u32 %v905_v1, %v904_v55  ;;  %v910_v28 = vshll.u32 %v1366_v3, %v898_v53  ;;  %v911_v42 = vshrl.u32 %v1367_v6, %v899_v41  ;;  %v991_v46 = vmul.f32 %v2156_v4, %v1992_v54 }
  0xeb   : > { %v2175_v51 = vshrl.u32 %v842_v29, 30  ;;  %v762_v61 = vxor.u32 2147483648, %v761_v10  ;;  %v900_v63 = vshrl.u32 %v1363_v59, %v899_v41  ;;  %v913_v16 = vshll.u32 %v1367_v6, %v898_v53 }
  0xec   : > { %v914_v45 = vshrl.u32 %v1368_v14, %v899_v41  ;;  %v677_v52 = vsel %vm667_vm14, nan, %v676_v34  ;;  %v903_v26 = vor.u32 %v902_v57, %v901_v13  ;;  %v992_v3 = vmul.f32 %v2156_v4, %v2017_v36 }
  0xed   : > { %v844_v56 = vshll.u32 %v2175_v51, 30  ;;  %v763_v54 = vsel %vm680_vm5, %v762_v61, %v761_v10  ;;  %v909_v33 = vor.u32 %v908_v7, %v907_v23  ;;  %v912_v59 = vor.u32 %v911_v42, %v910_v28 }
  0xee   : > { %vm916_vm1 = vcmp.lt.s32.totalorder %v897_v24, 1  ;;  %v766_v6 = vsel %vm2096_vm9, %v1792_v31, %v763_v54  ;;  %v915_v9 = vor.u32 %v914_v45, %v913_v16  ;;  %vm919_vm2 = vcmp.lt.s32.totalorder %v897_v24, 4 }
  0xef   : > { %v2195_v14 = vsub.s32 %v841_v20, %v844_v56  ;;  %1253 = vcosq.f32 %v766_v6  ;;  %vm918_vm3 = vcmp.lt.s32.totalorder %v897_v24, 3  ;;  %v920_v25 = vsel %vm916_vm1, %v900_v63, %v903_v26 }
  0xf0   : > { %v921_v36 = vsel %vm919_vm2, %v909_v33, 2102212464  ;;  %1255 = vsinq.f32 %v766_v6  ;;  %vm917_vm4 = vcmp.lt.s32.totalorder %v897_v24, 2  ;;  %v924_v43 = vsel %vm916_vm1, %v903_v26, %v906_v5 }
  0xf1   : > { %v847_v19 = vsub.s32 0, %v2195_v14  ;;  %v922_v50 = vsel %vm918_vm3, %v906_v5, %v921_v36  ;;  %v925_v30 = vsel %vm919_vm2, %v912_v59, 920167782  ;;  %v928_v60 = vsel %vm916_vm1, %v906_v5, %v909_v33 }
  0xf2   : > { %v923_v53 = vsel %vm917_vm4, %v920_v25, %v922_v50  ;;  %v771_v41 = vand.u32 3, %v767_v12  ;;  %v993_v49 = vmul.f32 %v2156_v4, %v2040_v22  ;;  %v926_v58 = vsel %vm918_vm3, %v909_v33, %v925_v30 }
  0xf3   : > { %v1128_v2 = vmin.u32 %v847_v19, %v2195_v14  ;;  %v929_v62 = vsel %vm919_vm2, %v915_v9, 1326507024  ;;  %v994_v35 = vmul.f32 %v2156_v4, %v2143_v32  ;;  %v995_v21 = vmul.f32 %v2156_v4, %v677_v52 }
  0xf4   : > { %v927_v0 = vsel %vm917_vm4, %v924_v43, %v926_v58  ;;  %v930_v11 = vsel %vm918_vm3, %v912_v59, %v929_v62  ;;  %v1003_v12 = vadd.f32 %v2160_v8, %v991_v46  ;;  %v1004_v40 = vadd.f32 %v2160_v8, %v992_v3 }
  0xf5   : > { %v849_v48 = vclz %v1128_v2  ;;  %v931_v20 = vsel %vm917_vm4, %v928_v60, %v930_v11  ;;  %v2224_v22 = vmul.u32.u64.low %v2150_v37, %v927_v0  ;;  %v2225_v13 = vmul.u32.u64.high %v2150_v37, %v927_v0, %v2224_v22 }
  0xf6   : > { %v2229_v32 = vmul.u32.u64.low %v2150_v37, %v931_v20  ;;  %v2230_v55 = vmul.u32.u64.high %v2150_v37, %v931_v20, %v2229_v32  ;;  %v1005_v1 = vadd.f32 %v2160_v8, %v993_v49  ;;  %1011 = vst [vmem:[%s2233_s11] sm:$0xff] %v1003_v12  ;;  %v1006_v24 = vadd.f32 %v2160_v8, %v994_v35  ;;  %1012 = vst [vmem:[%s2233_s11 + $0x8] sm:$0xff] %v1004_v40 }
  0xf7   : > { %v1129_v47 = vadd.s32 4294967294, %v849_v48  ;;  %v1007_v44 = vadd.f32 %v2160_v8, %v995_v21  ;;  %vm770_vm5 = vweird.f32 %v1792_v31  ;;  %vm773_vm6 = vcmp.eq.s32.totalorder %v771_v41, 0 }
  0xf8   : > { %v837_v29 = vadd.s32 %v2119_v17, %v2137_v38  ;;  %1013 = vst [vmem:[%s2233_s11 + $0x10] sm:$0xff] %v1005_v1  ;;  %vm776_vm8 = vcmp.eq.s32.totalorder %v771_v41, 2  ;;  %v939_v34 = vmul.u32 %v2150_v37, %v923_v53  ;;  %v942_v10 = vadd.s32 1, %v2225_v13  ;;  %1014 = vst [vmem:[%s2233_s11 + $0x18] sm:$0xff] %v1006_v24 }
  0xf9   : > { %vm1130_vm7 = vcmp.lt.s32.totalorder %v1129_v47, 0  ;;  %v1254_v57 = vpop.eup %1253  ;;  %1015 = vst [vmem:[%s2233_s11 + $0x20] sm:$0xff] %v1007_v44  ;;  %vm772_vm9 = vcmp.lt.s32.totalorder %v771_v41, 2  ;;  %v940_v17 = vadd.s32 %v2224_v22, %v2230_v55  ;;  %vm941_vm10 = vc.u32 %v2230_v55, %v2224_v22 }
  0xfa   : > { %v852_v23 = vsel %vm1130_vm7, 0, %v1129_v47  ;;  %v1256_v5 = vpop.eup %1255  ;;  %v777_v7 = vxor.u32 2147483648, %v1254_v57  ;;  %v943_v37 = vsel %vm941_vm10, %v942_v10, %v2225_v13  ;;  %vm783_vm11 = vcmp.lt.s32.totalorder %v1795_v15, 0 }
  0xfb   : > { %v853_v28 = vsub.s32 32, %v852_v23  ;;  %v854_v42 = vshll.u32 %v2195_v14, %v852_v23  ;;  %v857_v46 = vsub.s32 4294967266, %v852_v23  ;;  %v774_v61 = vxor.u32 2147483648, %v1256_v5 }
  0xfc   : > { %v778_v38 = vsel %vm776_vm8, %v777_v7, %v1256_v5  ;;  %v944_v52 = vadd.s32 %v943_v37, %v939_v34  ;;  %vm782_vm12 = vcmp.le.f32.partialorder %v781_v18, 0.7853982  ;;  %v867_v43 = vsub.s32 4, %v2175_v51 }
  0xfd   : > { %v855_v63 = vshrl.u32 %v837_v29, %v853_v28  ;;  %v858_v16 = vadd.s32 127, %v857_v46  ;;  %v775_v45 = vsel %vm773_vm6, %v1254_v57, %v774_v61  ;;  %vm873_vm1 = vweird.f32 %v1795_v15 }
  0xfe   : > { %v779_v56 = vsel %vm772_vm9, %v775_v45, %v778_v38  ;;  %v945_v33 = vadd.s32 536870912, %v944_v52  ;;  %v868_v49 = vsel %vm783_vm11, %v867_v43, %v2175_v51  ;;  %vm886_vm2 = vcmp.lt.s32.totalorder %v1500_v27, 0 }
  0xff   : > { %v856_v26 = vor.u32 %v855_v63, %v854_v42  ;;  %v859_v3 = vshll.u32 %v858_v16, 23  ;;  %v780_v54 = vsel %vm770_vm5, nan, %v779_v56  ;;  %v870_v62 = vsel %vm782_vm12, 0, %v868_v49 }
 0x100   : > { %v996_v14 = vmul.f32 %v2156_v4, %v780_v54  ;;  %v946_v9 = vshrl.u32 %v945_v33, 30  ;;  %v874_v21 = vand.u32 3, %v870_v62  ;;  %vm885_vm3 = vcmp.le.f32.partialorder %v884_v39, 0.7853982 }
 0x101   : > { %v860_v59 = vor.u32 4788187, %v859_v3  ;;  %v863_v6 = vcvt.s32.f32 %v856_v26  ;;  %vm976_vm7 = vweird.f32 %v1500_v27 }
 0x102   : > { %v1008_v36 = vadd.f32 %v2160_v8, %v996_v14  ;;  %v947_v19 = vshll.u32 %v946_v9, 30  ;;  %vm879_vm14 = vcmp.eq.s32.totalorder %v874_v21, 2  ;;  %vm876_vm15 = vcmp.eq.s32.totalorder %v874_v21, 0 }
 0x103   : > { %v861_v25 = vand.u32 2147483647, %v860_v59  ;;  %vm875_vm0 = vcmp.lt.s32.totalorder %v874_v21, 2  ;;  %v970_v7 = vsub.s32 4, %v946_v9 }
 0x104   : > { %1016 = vst [vmem:[%s2233_s11 + $0x28] sm:$0xff] %v1008_v36  ;;  %v948_v53 = vsub.s32 %v944_v52, %v947_v19 }
 0x105   : > { %v864_v50 = vmul.f32 %v863_v6, %v861_v25  ;;  %v971_v46 = vsel %vm886_vm2, %v970_v7, %v946_v9 }
 0x106   : > { %v950_v30 = vsub.s32 0, %v948_v53  ;;  %v973_v61 = vsel %vm885_vm3, 0, %v971_v46 }
 0x107   : > { %v865_v31 = vxor.u32 2147483648, %v864_v50 }
 0x108   : > { %v1132_v2 = vmin.u32 %v950_v30, %v948_v53 }
 0x109   : > { %v866_v60 = vsel %vm783_vm11, %v865_v31, %v864_v50 }
 0x10a   : > { %v869_v41 = vsel %vm782_vm12, %v1795_v15, %v866_v60  ;;  %v952_v58 = vclz %v1132_v2 }
 0x10b   : > { %1257 = vcosq.f32 %v869_v41 }
 0x10c   : > { %1259 = vsinq.f32 %v869_v41  ;;  %v1133_v35 = vadd.s32 4294967294, %v952_v58 }
 0x10e   : > { %vm1134_vm13 = vcmp.lt.s32.totalorder %v1133_v35, 0 }
 0x10f   : > { %v955_v48 = vsel %vm1134_vm13, 0, %v1133_v35 }
 0x110   : > { %v956_v0 = vsub.s32 32, %v955_v48  ;;  %v957_v18 = vshll.u32 %v948_v53, %v955_v48  ;;  %v960_v11 = vsub.s32 4294967266, %v955_v48 }
 0x112   : > { %v958_v12 = vshrl.u32 %v940_v17, %v956_v0  ;;  %v961_v20 = vadd.s32 127, %v960_v11  ;;  %v977_v17 = vand.u32 3, %v973_v61 }
 0x114   : > { %v959_v47 = vor.u32 %v958_v12, %v957_v18  ;;  %v962_v51 = vshll.u32 %v961_v20, 23  ;;  %vm982_vm4 = vcmp.eq.s32.totalorder %v977_v17, 2  ;;  %vm979_vm5 = vcmp.eq.s32.totalorder %v977_v17, 0 }
 0x115   : > { %v1258_v22 = vpop.eup %1257  ;;  %vm978_vm6 = vcmp.lt.s32.totalorder %v977_v17, 2 }
 0x116   : > { %v1260_v13 = vpop.eup %1259  ;;  %v880_v40 = vxor.u32 2147483648, %v1258_v22  ;;  %v963_v1 = vor.u32 4788187, %v962_v51  ;;  %v966_v24 = vcvt.s32.f32 %v959_v47 }
 0x117   : > { %v877_v32 = vxor.u32 2147483648, %v1260_v13 }
 0x118   : > { %v881_v55 = vsel %vm879_vm14, %v880_v40, %v1260_v13  ;;  %v964_v57 = vand.u32 2147483647, %v963_v1 }
 0x119   : > { %v878_v44 = vsel %vm876_vm15, %v1258_v22, %v877_v32 }
 0x11a   : > { %v882_v29 = vsel %vm875_vm0, %v878_v44, %v881_v55  ;;  %v967_v34 = vmul.f32 %v966_v24, %v964_v57 }
 0x11b   : > { %v883_v23 = vsel %vm873_vm1, nan, %v882_v29 }
 0x11c   : > { %v997_v10 = vmul.f32 %v2156_v4, %v883_v23  ;;  %v968_v5 = vxor.u32 2147483648, %v967_v34 }
 0x11e   : > { %v1009_v15 = vadd.f32 %v2160_v8, %v997_v10  ;;  %v969_v28 = vsel %vm886_vm2, %v968_v5, %v967_v34 }
 0x11f   : > { %v972_v42 = vsel %vm885_vm3, %v1500_v27, %v969_v28 }
 0x120   : > { %1017 = vst [vmem:[%s2233_s11 + $0x30] sm:$0xff] %v1009_v15  ;;  %1261 = vcosq.f32 %v972_v42 }
 0x121   : > { %1263 = vsinq.f32 %v972_v42 }
 0x12a   : > { %v1262_v38 = vpop.eup %1261 }
 0x12b   : > { %v1264_v63 = vpop.eup %1263  ;;  %v983_v39 = vxor.u32 2147483648, %v1262_v38 }
 0x12c   : > { %v980_v16 = vxor.u32 2147483648, %v1264_v63 }
 0x12d   : > { %v984_v37 = vsel %vm982_vm4, %v983_v39, %v1264_v63 }
 0x12e   : > { %v981_v45 = vsel %vm979_vm5, %v1262_v38, %v980_v16 }
 0x12f   : > { %v985_v52 = vsel %vm978_vm6, %v981_v45, %v984_v37 }
 0x130   : > { %v986_v56 = vsel %vm976_vm7, nan, %v985_v52 }
 0x131   : > { %v998_v26 = vmul.f32 %v2156_v4, %v986_v56 }
 0x133   : > { %v1010_v27 = vadd.f32 %v2160_v8, %v998_v26 }
 0x135   : > { %1018 = vst [vmem:[%s2233_s11 + $0x38] sm:$0xff] %v1010_v27 }
 0x136   : > { %1307 = shalt.err (!%p1304_p4)
}
 0x137   : > { %s1308_s25 = scalar_lea.hbm %s2278_s20, 1024  ;;  %s1312_s28 = scalar_lea.hbm %s2328_s1, 4096 }
 0x138   : > { %p1309_p7 = scmp.ne.s32.totalorder %s2278_s20, %s1308_s25  ;;  %p1313_p13 = scmp.lt.u32.totalorder %s2278_s20, %s2328_s1 }
 0x139   : > { %p1314_p1 = scmp.lt.u32.totalorder %s1312_s28, %s1308_s25  ;;  %p1316_p5 = scmp.lt.u32.totalorder %s1308_s25, %s2278_s20 }
 0x13a   : > { %p1310_p8 = pnand %p1309_p7, %p2351_p6 }
 0x13b   : > { %p1315_p0 = por %p1314_p1, %p1313_p13 }
 0x13c   : > { %p1311_p11 = pneg %p1310_p8 }
 0x13d   : > { %p1317_p9 = por %p1316_p5, %p1315_p0 }
 0x13f   : > { %p1318_p10 = pnand %p1317_p9, %p1311_p11 }
 0x141   : > { %1321 = shalt.err (!%p1318_p10)
}
 0x142   : > { %s1370_s2 = smov 128   ;;  %s1371_s3 = smov 8  }
 0x143   : > { %1179 = dma.vmem_to_hbm [thread:$0]  (%p2351_p6), %s2280_s14, 1024, %s2278_s20, %s2286_s21, %s1370_s2, %s1370_s2, %s1371_s3  }
 0x144 PF: > { %p1191_p12 = scmp.ge.s32.totalorder %s1360_s9, 2  ;;  %s1049_s4 = sand.u32 1, %s1348_s6  }
 0x145   : > { %p2352_p2 = scmp.ne.s32.totalorder %s2333_s17, 0  ;;  %s1050_s5 = scalar_lea.sflag [#allocation4], %s1049_s4 }
 0x147   : > { %p1186_p3 = pnand %p1191_p12, %p2352_p2 }
 0x149   : > { %1343 = dma.done.wait (!%p1186_p3), %s1050_s5, 1024  }
 0x14a   : > { %1345 = vsyncadd (!%p1186_p3), %s1050_s5, 4294966272  ;;  %p12_p4 = scmp.ge.s32.totalorder %s1407_s12, 6   ;;  %s2353_s6 = smov %s1352_s7 }
 0x14b   : > { %s2354_s7 = smov %s1356_s8  ;;  %s2355_s8 = smov %s1418_s15 }
 0x14c   : > { %s2356_s9 = smov %s1407_s12  ;;  %14 = sbr.rel (!%p12_p4) target bundleno = 4 (0x4), region = 61 }
 0x153   :  { %1055 = vsyncpa [#allocation3], 1 }
 0x154   :  { %1057 = vsyncpa [#allocation3 + $0x1], 1 }
 0x155   :  { %1058 = vsyncpa [#allocation4], 1 }
 0x156   :  { %1060 = vsyncpa [#allocation4 + $0x1], 1 }

</bundles_post_ra>
